<compile_context>
chip_gen: v7x
topology: tpu7x:2x2x1
jax: 0.10.0
libtpu: 0.0.40
codegen_flags: <defaults>
</compile_context>

<pallas_src>
import functools

import jax
import jax.numpy as jnp
from jax.experimental import pallas as pl
from jax.experimental.pallas import tpu as pltpu


def _round_up(v, m):
    return (v + m - 1) // m * m


def _feature_tiles(in_features, out_features, num_pieces):
    """Batch-independent tile sizes / padded feature dims. Shared by
    prepare_maxout_params and maxout so the layouts always agree."""
    Np128 = _round_up(out_features, 128)
    # Grow tn while the fused matmul width (P*tn lanes) stays <= 1024 and we
    # do not over-pad a small output layer.
    tn = 128
    while tn * 2 <= Np128 and num_pieces * tn * 2 <= 1024:
        tn *= 2
    Np = _round_up(out_features, tn)

    Kp128 = _round_up(in_features, 128)
    # Single K step for most layers; big lane-aligned tile otherwise.
    tk = Kp128 if Kp128 <= 2048 else 1024
    Kp = _round_up(in_features, tk)
    return tk, tn, Kp, Np


def _batch_tile(batch, tk, tn, num_pieces, n_blocks, *, vmem_budget=28 << 20):
    """Largest batch tile whose working set fits the VMEM budget, so the
    weight slab is re-streamed only Bp//tm times (ideally once)."""
    Bp = _round_up(batch, 8)
    tm = Bp

    def data_bytes(tm_):
        x_b = 2 * tm_ * tk * 2                    # double-buffered bf16 x tile
        w_b = 2 * tk * num_pieces * tn * 2        # double-buffered bf16 weights
        acc = tm_ * num_pieces * tn * 4           # f32 accumulator scratch
        o_b = 2 * tm_ * tn * 4                    # double-buffered f32 out tile
        b_b = 2 * num_pieces * tn * 4             # bias tile
        return x_b + w_b + acc + o_b + b_b

    while tm > 8 and data_bytes(tm) > vmem_budget:
        tm = _round_up(tm // 2, 8)

    # v7x has 2 TensorCores sharing the grid via "parallel" axes: if the N grid
    # would otherwise be a single tile, split the batch into 2 M tiles.
    if n_blocks == 1 and tm == Bp and Bp >= 16 and (Bp // 2) % 8 == 0:
        tm = Bp // 2

    Bp = _round_up(batch, tm)
    return tm, Bp


def prepare_maxout_params(weight, bias, in_features, out_features, num_pieces,
                          *, compute_dtype=jnp.bfloat16):
    """One-time re-layout of the nn.Linear params (do at load time, not per call).

    weight: (out_features*num_pieces, in_features), row index = o*P + p
            (the grouping implied by `y.view(-1, out, P).max(2)`).
    Returns:
      w2: (Kp, n_blocks*P*tn) compute_dtype,
          w2[k, j*P*tn + p*tn + ol] = weight[(j*tn + ol)*P + p, k]
      b2: (P, Np) float32,  b2[p, o] = bias[o*P + p]
    """
    P = num_pieces
    OP, K = weight.shape
    assert OP == out_features * P and K == in_features
    tk, tn, Kp, Np = _feature_tiles(in_features, out_features, P)
    n_blocks = Np // tn

    w = weight.astype(jnp.float32).reshape(out_features, P, K)        # [o, p, k]
    w = jnp.pad(w, ((0, Np - out_features), (0, 0), (0, Kp - K)))
    w = w.reshape(n_blocks, tn, P, Kp).transpose(3, 0, 2, 1)          # [k, j, p, ol]
    w2 = w.reshape(Kp, n_blocks * P * tn).astype(compute_dtype)

    b = bias.astype(jnp.float32).reshape(out_features, P).T           # (P, out)
    b2 = jnp.pad(b, ((0, 0), (0, Np - out_features)))                 # (P, Np)
    return w2, b2


def _piece_max(y, b, num_pieces, tn):
    """y: (tm, P*tn) f32 pre-bias logits; b: (P, tn) f32 bias.
    Returns max over pieces of (y + bias): (tm, tn)."""
    m = y[:, :tn] + b[0:1, :]
    for p in range(1, num_pieces):                 # static, tile-aligned slices
        lo = p * tn
        m = jnp.maximum(m, y[:, lo:lo + tn] + b[p:p + 1, :])
    return m


def _maxout_kernel(x_ref, w_ref, b_ref, o_ref, acc_ref, *, num_pieces, tn, n_k):
    # x_ref:   (tm, tk)      bf16
    # w_ref:   (tk, P*tn)    bf16  (piece-major lane layout, pre-transposed)
    # b_ref:   (P, tn)       f32
    # o_ref:   (tm, tn)      f32   (output-resident across the K axis)
    # acc_ref: (tm, P*tn)    f32   VMEM accumulator (unused when n_k == 1)
    d = jnp.dot(x_ref[...], w_ref[...], preferred_element_type=jnp.float32)

    if n_k == 1:
        # Single K step: no accumulator round-trip through VMEM.
        o_ref[...] = _piece_max(d, b_ref[...], num_pieces, tn).astype(o_ref.dtype)
    else:
        k = pl.program_id(2)

        @pl.when(k == 0)
        def _init():
            acc_ref[...] = d               # direct write: no zero-fill + reload

        @pl.when(k > 0)
        def _accum():
            acc_ref[...] += d

        @pl.when(k == n_k - 1)
        def _epilogue():
            o_ref[...] = _piece_max(acc_ref[...], b_ref[...],
                                    num_pieces, tn).astype(o_ref.dtype)


@functools.partial(jax.jit,
                   static_argnames=("in_features", "out_features", "num_pieces"))
def maxout(x, w2, b2, *, in_features, out_features, num_pieces):
    """x: (B, in_features). w2/b2 from prepare_maxout_params.
    Returns (B, out_features) float32 (matches the PyTorch forward)."""
    B = x.shape[0]
    P = num_pieces
    tk, tn, Kp, Np = _feature_tiles(in_features, out_features, P)
    n_blocks = Np // tn
    assert w2.shape == (Kp, n_blocks * P * tn)
    assert b2.shape == (P, Np)
    tm, Bp = _batch_tile(B, tk, tn, P, n_blocks)
    n_k = Kp // tk

    xp = x.astype(w2.dtype)
    if (Bp, Kp) != (B, in_features):
        xp = jnp.pad(xp, ((0, Bp - B), (0, Kp - in_features)))

    grid = (Bp // tm, n_blocks, n_k)
    kernel = functools.partial(_maxout_kernel, num_pieces=P, tn=tn, n_k=n_k)

    # Note: int8 weights (per-column scales applied in the epilogue) would
    # further halve weight HBM bytes on v5e/v6e (not v7x: fp8-only MXU).
    out = pl.pallas_call(
        kernel,
        out_shape=jax.ShapeDtypeStruct((Bp, Np), jnp.float32),
        grid_spec=pltpu.PrefetchScalarGridSpec(
            num_scalar_prefetch=0,
            grid=grid,
            in_specs=[
                pl.BlockSpec((tm, tk), lambda i, j, k: (i, k)),
                pl.BlockSpec((tk, P * tn), lambda i, j, k: (k, j)),
                pl.BlockSpec((P, tn), lambda i, j, k: (0, j)),
            ],
            out_specs=pl.BlockSpec((tm, tn), lambda i, j, k: (i, j)),
            scratch_shapes=[pltpu.VMEM((tm, P * tn), jnp.float32)],
        ),
        compiler_params=pltpu.CompilerParams(
            dimension_semantics=("parallel", "parallel", "arbitrary"),
            vmem_limit_bytes=48 << 20,    # safe on v5e/v6e (128 MiB) & v7x (64 MiB)
        ),
    )(xp, w2, b2)

    return out[:B, :out_features]


if __name__ == "__main__":
    # Shapes consistent with Maxout(in_features=32, out_features=16, num_pieces=4)
    # applied to a batch of 8.
    B, in_features, out_features, num_pieces = 8, 32, 16, 4

    key = jax.random.PRNGKey(0)
    k_x, k_w, k_b = jax.random.split(key, 3)

    x = jax.random.normal(k_x, (B, in_features), dtype=jnp.float32)
    # Deterministic "synthetic checkpoint": uniform init like nn.Linear default.
    bound = 1.0 / (in_features ** 0.5)
    weight = jax.random.uniform(k_w, (out_features * num_pieces, in_features),
                                minval=-bound, maxval=bound, dtype=jnp.float32)
    bias = jax.random.uniform(k_b, (out_features * num_pieces,),
                              minval=-bound, maxval=bound, dtype=jnp.float32)

    # One-time param re-layout (outside the per-call path).
    w2, b2 = prepare_maxout_params(weight, bias, in_features, out_features,
                                   num_pieces)

    out = maxout(x, w2, b2, in_features=in_features,
                 out_features=out_features, num_pieces=num_pieces)
    out = jax.block_until_ready(out)

    # Reference of the PyTorch forward with the same bf16 operand quantization
    # (accumulation stays f32 on both paths).
    xb = x.astype(jnp.bfloat16).astype(jnp.float32)
    wb = weight.astype(jnp.bfloat16).astype(jnp.float32)
    y_ref = xb @ wb.T + bias
    y_ref = y_ref.reshape(-1, out_features, num_pieces).max(axis=2)

    assert out.shape == (B, out_features)
    assert jnp.allclose(out, y_ref, atol=1e-4, rtol=1e-3), "mismatch vs reference"

    print("KERNEL_OK")
</pallas_src>

<mosaic_0001>
module attributes {stable_mosaic.version = 11 : i64} {
  func.func @_maxout_kernel(%arg0: i32, %arg1: i32, %arg2: i32, %arg3: memref<8x128xbf16, #tpu.memory_space<vmem>>, %arg4: memref<128x512xbf16, #tpu.memory_space<vmem>>, %arg5: memref<4x128xf32, #tpu.memory_space<vmem>>, %arg6: memref<8x128xf32, #tpu.memory_space<vmem>>, %arg7: memref<8x512xf32, #tpu.memory_space<vmem>>) attributes {dimension_semantics = [#tpu.dimension_semantics<parallel>, #tpu.dimension_semantics<parallel>, #tpu.dimension_semantics<arbitrary>], iteration_bounds = array<i64: 1, 1, 1>, scalar_prefetch = 0 : i64, scratch_operands = 1 : i64, tpu.core_type = #tpu.core_type<tc>, window_params = [{transform_indices = @transform_0, window_bounds = array<i64: 8, 128>}, {transform_indices = @transform_1, window_bounds = array<i64: 128, 512>}, {transform_indices = @transform_2, window_bounds = array<i64: 4, 128>}, {transform_indices = @transform_3, window_bounds = array<i64: 8, 128>}]} {
    %c0 = arith.constant 0 : index
    %c0_0 = arith.constant 0 : index
    %0 = vector.load %arg3[%c0, %c0_0] : memref<8x128xbf16, #tpu.memory_space<vmem>>, vector<8x128xbf16>
    %c0_1 = arith.constant 0 : index
    %c0_2 = arith.constant 0 : index
    %1 = vector.load %arg4[%c0_1, %c0_2] : memref<128x512xbf16, #tpu.memory_space<vmem>>, vector<128x512xbf16>
    %cst = arith.constant dense<0.000000e+00> : vector<8x512xf32>
    %2 = tpu.matmul %0, %1, %cst {dimension_numbers = #tpu.dot_dimension_numbers<[1], [0], [0], [1], [0, 0, 1, 1], [], []>} : vector<8x128xbf16>, vector<128x512xbf16>, vector<8x512xf32> -> vector<8x512xf32>
    %c0_3 = arith.constant 0 : index
    %c0_4 = arith.constant 0 : index
    %3 = vector.load %arg5[%c0_3, %c0_4] : memref<4x128xf32, #tpu.memory_space<vmem>>, vector<4x128xf32>
    %4 = vector.extract_strided_slice %2 {offsets = [0, 0], sizes = [8, 128], strides = [1, 1]} : vector<8x512xf32> to vector<8x128xf32>
    %5 = vector.extract_strided_slice %3 {offsets = [0, 0], sizes = [1, 128], strides = [1, 1]} : vector<4x128xf32> to vector<1x128xf32>
    %6 = vector.broadcast %5 : vector<1x128xf32> to vector<8x128xf32>
    %7 = arith.addf %4, %6 : vector<8x128xf32>
    %8 = vector.extract_strided_slice %2 {offsets = [0, 128], sizes = [8, 128], strides = [1, 1]} : vector<8x512xf32> to vector<8x128xf32>
    %9 = vector.extract_strided_slice %3 {offsets = [1, 0], sizes = [1, 128], strides = [1, 1]} : vector<4x128xf32> to vector<1x128xf32>
    %10 = vector.broadcast %9 : vector<1x128xf32> to vector<8x128xf32>
    %11 = arith.addf %8, %10 : vector<8x128xf32>
    %12 = arith.maximumf %7, %11 : vector<8x128xf32>
    %13 = vector.extract_strided_slice %2 {offsets = [0, 256], sizes = [8, 128], strides = [1, 1]} : vector<8x512xf32> to vector<8x128xf32>
    %14 = vector.extract_strided_slice %3 {offsets = [2, 0], sizes = [1, 128], strides = [1, 1]} : vector<4x128xf32> to vector<1x128xf32>
    %15 = vector.broadcast %14 : vector<1x128xf32> to vector<8x128xf32>
    %16 = arith.addf %13, %15 : vector<8x128xf32>
    %17 = arith.maximumf %12, %16 : vector<8x128xf32>
    %18 = vector.extract_strided_slice %2 {offsets = [0, 384], sizes = [8, 128], strides = [1, 1]} : vector<8x512xf32> to vector<8x128xf32>
    %19 = vector.extract_strided_slice %3 {offsets = [3, 0], sizes = [1, 128], strides = [1, 1]} : vector<4x128xf32> to vector<1x128xf32>
    %20 = vector.broadcast %19 : vector<1x128xf32> to vector<8x128xf32>
    %21 = arith.addf %18, %20 : vector<8x128xf32>
    %22 = arith.maximumf %17, %21 : vector<8x128xf32>
    %c0_5 = arith.constant 0 : index
    %c0_6 = arith.constant 0 : index
    %23 = vector.load %arg6[%c0_5, %c0_6] : memref<8x128xf32, #tpu.memory_space<vmem>>, vector<8x128xf32>
    tpu.vector_store %arg6[%c0_5, %c0_6], %22 {strides = array<i32>} : memref<8x128xf32, #tpu.memory_space<vmem>>, vector<8x128xf32>,
    return
  }
  func.func @transform_0(%arg0: i32, %arg1: i32, %arg2: i32) -> (i32, i32) {
    %c0_i32 = arith.constant 0 : i32
    return %arg0, %arg2 : i32, i32
  }
  func.func @transform_1(%arg0: i32, %arg1: i32, %arg2: i32) -> (i32, i32) {
    %c0_i32 = arith.constant 0 : i32
    return %arg2, %arg1 : i32, i32
  }
  func.func @transform_2(%arg0: i32, %arg1: i32, %arg2: i32) -> (i32, i32) {
    %c0_i32 = arith.constant 0 : i32
    %c0_i32_0 = arith.constant 0 : i32
    return %c0_i32, %arg1 : i32, i32
  }
  func.func @transform_3(%arg0: i32, %arg1: i32, %arg2: i32) -> (i32, i32) {
    %c0_i32 = arith.constant 0 : i32
    return %arg0, %arg1 : i32, i32
  }
}

</mosaic_0001>

<bundles_post_ra>
// kernel: maxout.1
= control target key start
LH: loop header
LB: loop body
LE: loop exit
PB: predicated region body
PF: predicated region fallthrough
CT: control target
= control target key end

     0   :  { %8 = vsyncpa [#allocation4], 0  ;;  %s533_s0 = inlined_call_operand.vmem [shape: bf16[8,128], index: 0, kind: input, shape index: {}]   ;;  %s534_s1 = inlined_call_operand.hbm [shape: bf16[128,512], index: 1, kind: input, shape index: {}]   ;;  %s535_s2 = inlined_call_operand.vmem [shape: f32[4,128], index: 2, kind: input, shape index: {}]   ;;  %s536_s3 = inlined_call_operand.hbm [shape: f32[8,128], index: 3, kind: output, shape index: {}]  }
   0x1   :  { %9 = vsyncpa [#allocation5], 0  ;;  %s478_s12 = smov [#allocation3]   ;;  %s430_s16 = scalar_lea.hbm %s534_s1, 4096 }
   0x2   :  { %s17_s13 = sshll.u32 %s478_s12, 4  ;;  %p431_p0 = scmp.ne.s32.totalorder %s534_s1, %s430_s16  ;;  %s18_s13 = int_to_ptr.vmem [resolvable:$true] %s17_s13 }
   0x3   :  { %p434_p1 = scmp.lt.u32.totalorder %s430_s16, %s534_s1 }
   0x5   :  { %p436_p2 = pnand %p434_p1, %p431_p0 }
   0x7   :  { %439 = shalt.err (!%p436_p2)
}
   0x8   :  { %s440_s21 = scalar_lea.vmem %s18_s13, 4096  ;;  %p445_p4 = scmp.lt.s32.totalorder %s18_s13, %s18_s13 }
   0x9   :  { %p441_p3 = scmp.ne.s32.totalorder %s18_s13, %s440_s21  ;;  %p446_p5 = scmp.lt.s32.totalorder %s440_s21, %s440_s21 }
   0xb   :  { %p447_p6 = por %p446_p5, %p445_p4 }
   0xd   :  { %p448_p7 = pnand %p447_p6, %p441_p3 }
   0xf   :  { %451 = shalt.err (!%p448_p7)
}
  0x10   :  { %s479_s22 = smov 256   ;;  %s480_s23 = smov 16  }
  0x11   :  { %23 = dma.hbm_to_vmem [thread:$0]  %s534_s1, 4096, %s18_s13, [#allocation4], %s479_s22, %s479_s22, %s480_s23  }
  0x12   :  { %474 = dma.done.wait [#allocation4], 4096  }
  0x13   :  { %475 = vsyncadd [#allocation4], 4294963200  ;;  %v481_v0 = vmov 0   ;;  %v382_v1 = vld [vmem:[#allocation3 + $0x4] ss:$16 sps:$4 sm:$0xff]   ;;  %v306_v34 = vlaneseq }
  0x14   :  { %255 = vmatprep.mubr.bf16.mxu0 %v481_v0  ;;  %296 = vmatprep.mubr.bf16.mxu1 %v481_v0  ;;  %v384_v2 = vld [vmem:[#allocation3 + $0xc] ss:$16 sps:$4 sm:$0xff]   ;;  %v386_v3 = vld [vmem:[#allocation3] ss:$16 sps:$4 sm:$0xff]   ;;  %v387_v4 = vld [vmem:[#allocation3 + $0x8] ss:$16 sps:$4 sm:$0xff]  }
  0x15   :  { %223 = vmatprep.subr.bf16.mxu0 %v382_v1  ;;  %264 = vmatprep.subr.bf16.mxu1 %v384_v2  ;;  %v388_v5 = vld [vmem:[#allocation3 + $0x24] ss:$16 sps:$4 sm:$0xff]   ;;  %v390_v6 = vld [vmem:[#allocation3 + $0x2c] ss:$16 sps:$4 sm:$0xff]   ;;  %v392_v7 = vld [vmem:[#allocation3 + $0x20] ss:$16 sps:$4 sm:$0xff]  }
  0x16   :  { %224 = vmatpush1.bf16.msra.mxu0 %v386_v3  ;;  %265 = vmatpush1.bf16.msra.mxu1 %v387_v4  ;;  %v393_v8 = vld [vmem:[#allocation3 + $0x28] ss:$16 sps:$4 sm:$0xff]   ;;  %v394_v9 = vld [vmem:[#allocation3 + $0x44] ss:$16 sps:$4 sm:$0xff]   ;;  %v396_v10 = vld [vmem:[#allocation3 + $0x4c] ss:$16 sps:$4 sm:$0xff]  }
  0x17   :  { %225 = vmatprep.subr.bf16.mxu0 %v388_v5  ;;  %266 = vmatprep.subr.bf16.mxu1 %v390_v6  ;;  %v398_v11 = vld [vmem:[#allocation3 + $0x40] ss:$16 sps:$4 sm:$0xff]   ;;  %v399_v12 = vld [vmem:[#allocation3 + $0x48] ss:$16 sps:$4 sm:$0xff]   ;;  %v400_v13 = vld [vmem:[#allocation3 + $0x64] ss:$16 sps:$4 sm:$0xff]  }
  0x18   :  { %v402_v14 = vld [vmem:[#allocation3 + $0x6c] ss:$16 sps:$4 sm:$0xff]   ;;  %v404_v15 = vld [vmem:[#allocation3 + $0x60] ss:$16 sps:$4 sm:$0xff]   ;;  %v405_v16 = vld [vmem:[#allocation3 + $0x68] ss:$16 sps:$4 sm:$0xff]  }
  0x19   :  { %v406_v17 = vld [vmem:[#allocation3 + $0x84] ss:$16 sps:$4 sm:$0xff]   ;;  %v408_v18 = vld [vmem:[#allocation3 + $0x8c] ss:$16 sps:$4 sm:$0xff]   ;;  %v410_v19 = vld [vmem:[#allocation3 + $0x80] ss:$16 sps:$4 sm:$0xff]  }
  0x1a   :  { %226 = vmatpush1.bf16.msra.mxu0 %v392_v7  ;;  %267 = vmatpush1.bf16.msra.mxu1 %v393_v8  ;;  %v411_v20 = vld [vmem:[#allocation3 + $0x88] ss:$16 sps:$4 sm:$0xff]   ;;  %v412_v21 = vld [vmem:[#allocation3 + $0xa4] ss:$16 sps:$4 sm:$0xff]   ;;  %v414_v22 = vld [vmem:[#allocation3 + $0xac] ss:$16 sps:$4 sm:$0xff]  }
  0x1b   :  { %227 = vmatprep.subr.bf16.mxu0 %v394_v9  ;;  %268 = vmatprep.subr.bf16.mxu1 %v396_v10  ;;  %v416_v23 = vld [vmem:[#allocation3 + $0xa0] ss:$16 sps:$4 sm:$0xff]   ;;  %v417_v24 = vld [vmem:[#allocation3 + $0xa8] ss:$16 sps:$4 sm:$0xff]   ;;  %v418_v25 = vld [vmem:[#allocation3 + $0xc4] ss:$16 sps:$4 sm:$0xff]  }
  0x1c   :  { %v420_v26 = vld [vmem:[#allocation3 + $0xcc] ss:$16 sps:$4 sm:$0xff]   ;;  %v422_v27 = vld [vmem:[#allocation3 + $0xc0] ss:$16 sps:$4 sm:$0xff]   ;;  %v423_v28 = vld [vmem:[#allocation3 + $0xc8] ss:$16 sps:$4 sm:$0xff]  }
  0x1d   :  { %v424_v29 = vld [vmem:[#allocation3 + $0xe4] ss:$16 sps:$4 sm:$0xff]   ;;  %v426_v30 = vld [vmem:[#allocation3 + $0xec] ss:$16 sps:$4 sm:$0xff]   ;;  %v428_v31 = vld [vmem:[#allocation3 + $0xe0] ss:$16 sps:$4 sm:$0xff]  }
  0x1e   :  { %228 = vmatpush1.bf16.msra.mxu0 %v398_v11  ;;  %269 = vmatpush1.bf16.msra.mxu1 %v399_v12  ;;  %v429_v32 = vld [vmem:[#allocation3 + $0xe8] ss:$16 sps:$4 sm:$0xff]   ;;  %v30_v33 = vld [vmem:[%s533_s0] sm:$0xf]  ;;  %v307_v35 = vshrl.u32 %v306_v34, 7  ;;  %s482_s0 = smov [#allocation6]  }
  0x1f   :  { %229 = vmatprep.subr.bf16.mxu0 %v400_v13  ;;  %270 = vmatprep.subr.bf16.mxu1 %v402_v14  ;;  %v305_v37 = vld [vmem:[%s535_s2] sm:$0xf]  ;;  %s336_s2 = sshll.u32 %s482_s0, 4  ;;  %s337_s2 = int_to_ptr.vmem [resolvable:$true] %s336_s2 }
  0x20   :  { %v308_v36 = vsub.s32 0, %v307_v35  ;;  %v319_v38 = vsub.s32 2, %v307_v35  ;;  %v313_v39 = vsub.s32 1, %v307_v35  ;;  %v325_v43 = vsub.s32 3, %v307_v35  ;;  %s452_s29 = scalar_lea.vmem %s337_s2, 128  ;;  %p457_p9 = scmp.lt.s32.totalorder %s337_s2, %s337_s2 }
  0x21   :  { %p453_p8 = scmp.ne.s32.totalorder %s337_s2, %s452_s29  ;;  %p458_p10 = scmp.lt.s32.totalorder %s452_s29, %s452_s29 }
  0x22   :  { %230 = vmatpush1.bf16.msra.mxu0 %v404_v15  ;;  %271 = vmatpush1.bf16.msra.mxu1 %v405_v16  ;;  %v309_v40 = vrot.slane %v305_v37, %v308_v36  ;;  %v320_v41 = vrot.slane %v305_v37, %v319_v38  ;;  %v314_v42 = vrot.slane %v305_v37, %v313_v39 }
  0x23   :  { %231 = vmatprep.subr.bf16.mxu0 %v406_v17  ;;  %272 = vmatprep.subr.bf16.mxu1 %v408_v18  ;;  %v326_v51 = vrot.slane %v305_v37, %v325_v43  ;;  %p459_p11 = por %p458_p10, %p457_p9 }
  0x25   :  { %p460_p12 = pnand %p459_p11, %p453_p8 }
  0x26   :  { %232 = vmatpush1.bf16.msra.mxu0 %v410_v19  ;;  %273 = vmatpush1.bf16.msra.mxu1 %v411_v20 }
  0x27   :  { %233 = vmatprep.subr.bf16.mxu0 %v412_v21  ;;  %274 = vmatprep.subr.bf16.mxu1 %v414_v22 }
  0x2a   :  { %234 = vmatpush1.bf16.msra.mxu0 %v416_v23  ;;  %275 = vmatpush1.bf16.msra.mxu1 %v417_v24 }
  0x2b   :  { %235 = vmatprep.subr.bf16.mxu0 %v418_v25  ;;  %276 = vmatprep.subr.bf16.mxu1 %v420_v26 }
  0x2e   :  { %236 = vmatpush1.bf16.msra.mxu0 %v422_v27  ;;  %277 = vmatpush1.bf16.msra.mxu1 %v423_v28 }
  0x2f   :  { %237 = vmatprep.subr.bf16.mxu0 %v424_v29  ;;  %278 = vmatprep.subr.bf16.mxu1 %v426_v30 }
  0x32   :  { %238 = vmatpush1.bf16.msra.mxu0 %v428_v31  ;;  %279 = vmatpush1.bf16.msra.mxu1 %v429_v32 }
  0x35   :  { %256 = vmatmul.mubr.bf16.vlgmr.msra.gmra.mrb[0].mxu0 %v30_v33  ;;  %297 = vmatmul.mubr.bf16.vlgmr.msra.gmra.mrb[0].mxu1 %v30_v33 }
 0x108   :  { %v257_v44 = vpop.f32.mrb[0].mxu0  ;;  %v298_v45 = vpop.f32.mrb[0].mxu1 }
 0x109   :  { %v310_v46 = vadd.f32 %v309_v40, %v257_v44  ;;  %v259_v47 = vpop.f32.mrb[1].mxu0  ;;  %v300_v48 = vpop.f32.mrb[1].mxu1  ;;  %v321_v49 = vadd.f32 %v320_v41, %v298_v45 }
 0x10a   :  { %v315_v50 = vadd.f32 %v314_v42, %v259_v47  ;;  %v261_v52 = vpop.f32.mrb[2].mxu0  ;;  %v302_v53 = vpop.f32.mrb[2].mxu1  ;;  %v327_v58 = vadd.f32 %v326_v51, %v300_v48 }
 0x10b   :  { %v262_v54 = vpop.f32.mrb[3].mxu0  ;;  %v303_v55 = vpop.f32.mrb[3].mxu1 }
 0x10c   :  { %v316_v56 = vmax.f32 %v310_v46, %v315_v50 }
 0x10e   :  { %v322_v57 = vmax.f32 %v316_v56, %v321_v49 }
 0x110   :  { %v328_v59 = vmax.f32 %v322_v57, %v327_v58 }
 0x112   :  { %329 = vst [vmem:[#allocation6] sm:$0xff] %v328_v59 }
 0x113   :  { %463 = shalt.err (!%p460_p12)
}
 0x114   :  { %s464_s5 = scalar_lea.hbm %s536_s3, 128 }
 0x115   :  { %p465_p13 = scmp.ne.s32.totalorder %s536_s3, %s464_s5  ;;  %p468_p0 = scmp.lt.u32.totalorder %s464_s5, %s536_s3 }
 0x117   :  { %p470_p1 = pnand %p468_p0, %p465_p13 }
 0x119   :  { %473 = shalt.err (!%p470_p1)
}
 0x11a   :  { %339 = dma.vmem_to_hbm [thread:$0]  %s337_s2, 128, %s536_s3, [#allocation5]  }
 0x11b   :  { %476 = dma.done.wait [#allocation5], 128  }
 0x11c   :  { %477 = vsyncadd [#allocation5], 4294967168 }
 0x11d   :  { %343 = vsyncpa [#allocation4], 1 }
 0x11e   :  { %344 = vsyncpa [#allocation5], 1 }

</bundles_post_ra>
